<compile_context>
chip_gen: v5e
topology: v5e:2x2
jax: 0.10.0
libtpu: 0.0.40
codegen_flags: <defaults>
</compile_context>

<pallas_src>
import functools

import jax
import jax.numpy as jnp
from jax import lax
from jax.experimental import pallas as pl
from jax.experimental.pallas import tpu as pltpu


def _round_up(x, m):
    return ((x + m - 1) // m) * m


def _cdiv(a, b):
    return -(-a // b)


def _num_tensorcores():
    """Best-effort TensorCore count (v7x: 2; v5e/v6e: 1). Falls back to 1."""
    try:
        info = pltpu.get_tpu_info()
        for attr in ("num_cores", "tensorcores_per_chip", "num_tensorcores",
                     "cores_per_chip", "tensor_cores"):
            v = getattr(info, attr, None)
            if isinstance(v, int) and 1 <= v <= 16:
                return v
    except Exception:
        pass
    try:
        v = getattr(jax.devices()[0], "num_cores", None)
        if isinstance(v, int) and 1 <= v <= 16:
            return v
    except Exception:
        pass
    return 1


def _kernel_body(kernel_type, approx_recip,
                 c_ref, x_ref, yt_ref, xn_ref, yn_ref, o_ref):
    # x_ref: (TM, D)   yt_ref: (D, TN)   xn_ref: (TM, 1)   yn_ref: (1, TN)
    # o_ref: (TM, TN)
    x = x_ref[...]
    yt = yt_ref[...]

    # Canonical MXU matmul: contract x's last dim against y^T's first dim.
    xy = lax.dot_general(
        x, yt, dimension_numbers=(((1,), (0,)), ((), ())),
        preferred_element_type=jnp.float32)                        # (TM, TN)

    # ||x||^2 + ||y||^2 - 2 x.y^T, clamped at 0 (cdist is >= 0).
    d2 = jnp.maximum(xn_ref[...] + yn_ref[...] - 2.0 * xy, 0.0)

    # c is precomputed in the wrapper:
    #   Gaussian: -1/scale   Cauchy: 1/scale   Quadratic: scale
    c = c_ref[0]
    if kernel_type == 'Gaussian':
        res = jnp.exp(d2 * c)                                      # EUP exp
    elif kernel_type == 'Cauchy':
        res = pl.reciprocal(1.0 + d2 * c, approx=approx_recip)
    elif kernel_type == 'Quadratic':
        res = 1.0 - d2 * pl.reciprocal(d2 + c, approx=approx_recip)
    else:
        raise ValueError(f"unknown kernel_type {kernel_type}")

    o_ref[...] = res.astype(o_ref.dtype)


def svgp_kernel(x, y, *, kernel_type='Gaussian', scale=0.1,
                tm=512, tn=1024, out_dtype=jnp.float32,
                approx_reciprocal=False):
    """Pallas equivalent of Kernel(kernel_type, scale).forward(x, y)."""
    if kernel_type not in ('Gaussian', 'Cauchy', 'Quadratic'):
        raise ValueError(f"unknown kernel_type {kernel_type}")
    if not isinstance(scale, jax.Array):
        assert float(scale) > 0.0, "scale must be positive"

    N, D = x.shape
    M, Dy = y.shape
    assert D == Dy, "feature dims must match"

    x = x.astype(jnp.float32)
    y = y.astype(jnp.float32)

    # --- Tile selection: large lane-dense tiles, clamped to the problem. -----
    tm = _round_up(max(8, int(tm)), 8)
    tn = _round_up(max(128, int(tn)), 128)
    if N <= tm:
        tm = N       # one block covers rows -> block == full dim (always legal)
    if M <= tn:
        tn = M       # one block covers cols
    # Keep every TensorCore busy (v7x has 2 TCs sharing HBM). On 1-TC chips
    # (v5e/v6e) this loop never runs, avoiding pointless grid-step overhead.
    cores = _num_tensorcores()
    while cores > 1 and _cdiv(N, tm) * _cdiv(M, tn) < cores:
        if tm > 8 and _cdiv(N, tm) < cores:
            tm = _round_up(_cdiv(tm, 2), 8)
        elif tn > 128 and _cdiv(M, tn) < cores:
            tn = _round_up(_cdiv(tn, 2), 128)      # stays lane-dense
        else:
            break

    # --- Hoisted pieces: y^T (lane-dense rhs), squared norms, scale scalar. --
    yt = y.T                                        # (D, M): one-time transpose
    xn = jnp.sum(x * x, axis=-1, keepdims=True)     # (N, 1)
    yn = jnp.sum(y * y, axis=-1, keepdims=True).T   # (1, M)

    scale_f = jnp.asarray(scale, dtype=jnp.float32)
    if kernel_type == 'Gaussian':
        c = -1.0 / scale_f
    elif kernel_type == 'Cauchy':
        c = 1.0 / scale_f
    else:  # Quadratic
        c = scale_f
    c_arr = c.reshape(1)

    # --- Grid / specs: grid = cdiv, Pallas masks partial trailing blocks. ----
    grid = (_cdiv(N, tm), _cdiv(M, tn))
    grid_spec = pltpu.PrefetchScalarGridSpec(
        num_scalar_prefetch=1,                      # c lives in SMEM
        grid=grid,
        in_specs=[
            pl.BlockSpec((tm, D), lambda i, j, s: (i, 0)),
            pl.BlockSpec((D, tn), lambda i, j, s: (0, j)),
            pl.BlockSpec((tm, 1), lambda i, j, s: (i, 0)),
            pl.BlockSpec((1, tn), lambda i, j, s: (0, j)),
        ],
        out_specs=pl.BlockSpec((tm, tn), lambda i, j, s: (i, j)),
    )

    out_itemsize = jnp.dtype(out_dtype).itemsize
    cost = pl.CostEstimate(
        flops=2 * N * M * D + 6 * N * M,
        transcendentals=N * M if kernel_type == 'Gaussian' else 0,
        bytes_accessed=4 * (N * D + M * D + N + M) + N * M * out_itemsize,
    )

    # Scoped-VMEM budget: double-buffered tiles + f32 compute temporaries,
    # with 2x headroom; floor 32 MiB (raises v5e's 16 MiB default), cap 64 MiB.
    vmem_est = (2 * tm * tn * out_itemsize
                + 2 * tm * D * 4 + 2 * D * tn * 4
                + 2 * (tm + tn) * 4
                + 2 * tm * tn * 4)
    vmem_limit = int(min(max(2 * vmem_est, 32 << 20), 64 << 20))

    out = pl.pallas_call(
        functools.partial(_kernel_body, kernel_type, approx_reciprocal),
        out_shape=jax.ShapeDtypeStruct((N, M), out_dtype),
        grid_spec=grid_spec,
        compiler_params=pltpu.CompilerParams(
            dimension_semantics=("parallel", "parallel"),
            vmem_limit_bytes=vmem_limit),
        cost_estimate=cost,
    )(c_arr, x, yt, xn, yn)
    return out


def _reference(x, y, kernel_type='Gaussian', scale=0.1):
    d2 = jnp.maximum(
        jnp.sum(x * x, -1)[:, None] + jnp.sum(y * y, -1)[None, :]
        - 2.0 * x @ y.T, 0.0)
    if kernel_type == 'Gaussian':
        return jnp.exp(-d2 / scale)
    if kernel_type == 'Cauchy':
        return 1.0 / (1.0 + d2 / scale)
    return 1.0 - d2 / (d2 + scale)


if __name__ == "__main__":
    key = jax.random.PRNGKey(0)
    kx, ky = jax.random.split(key)
    # GP kernel matrix shapes: x = (N, D) data points, y = (M, D) inducing pts.
    N, M, D = 128, 256, 16
    x = jax.random.normal(kx, (N, D), dtype=jnp.float32)
    y = jax.random.normal(ky, (M, D), dtype=jnp.float32)

    # Exact paths (no approximate ops) -> f32-level tolerance.
    ref_g = _reference(x, y, 'Gaussian', 0.1)
    for kt in ('Gaussian', 'Cauchy', 'Quadratic'):
        out = jax.block_until_ready(svgp_kernel(x, y, kernel_type=kt, scale=0.1))
        ref = _reference(x, y, kt, 0.1)
        assert out.shape == (N, M)
        assert jnp.allclose(out, ref, atol=1e-4, rtol=1e-4), f"{kt} mismatch"

    # Ragged shapes: single full-extent blocks, no padding, no output slice.
    xr, yr = x[:120], y[:200]
    o = jax.block_until_ready(svgp_kernel(xr, yr, kernel_type='Gaussian', scale=0.1))
    r = _reference(xr, yr, 'Gaussian', 0.1)
    assert o.shape == (120, 200)
    assert jnp.allclose(o, r, atol=1e-4, rtol=1e-4), "ragged Gaussian mismatch"

    # Force small tiles -> multi-block grid with masked partial trailing blocks.
    o2 = jax.block_until_ready(
        svgp_kernel(xr, yr, kernel_type='Cauchy', scale=0.1, tm=64, tn=128))
    r2 = _reference(xr, yr, 'Cauchy', 0.1)
    assert o2.shape == (120, 200)
    assert jnp.allclose(o2, r2, atol=1e-4, rtol=1e-4), "partial-block Cauchy mismatch"

    # bf16 output halves writeback bytes (the binding resource); loose tolerance.
    ob = jax.block_until_ready(
        svgp_kernel(x, y, kernel_type='Gaussian', scale=0.1,
                    out_dtype=jnp.bfloat16))
    assert ob.dtype == jnp.bfloat16
    assert jnp.allclose(ob.astype(jnp.float32), ref_g, atol=2e-2, rtol=2e-2), \
        "bf16 Gaussian mismatch"

    print("KERNEL_OK")
</pallas_src>

<mosaic_0001>
module attributes {stable_mosaic.version = 11 : i64} {
  func.func @_kernel_body(%arg0: i32, %arg1: i32, %arg2: memref<1xf32, #tpu.memory_space<smem>>, %arg3: memref<128x16xf32, #tpu.memory_space<vmem>>, %arg4: memref<16x256xf32, #tpu.memory_space<vmem>>, %arg5: memref<128x1xf32, #tpu.memory_space<vmem>>, %arg6: memref<1x256xf32, #tpu.memory_space<vmem>>, %arg7: memref<128x256xf32, #tpu.memory_space<vmem>>) attributes {dimension_semantics = [#tpu.dimension_semantics<parallel>, #tpu.dimension_semantics<parallel>], iteration_bounds = array<i64: 1, 1>, scalar_prefetch = 1 : i64, scratch_operands = 0 : i64, tpu.core_type = #tpu.core_type<tc>, window_params = [{transform_indices = @transform_0, window_bounds = array<i64: 128, 16>}, {transform_indices = @transform_1, window_bounds = array<i64: 16, 256>}, {transform_indices = @transform_2, window_bounds = array<i64: 128, 1>}, {transform_indices = @transform_3, window_bounds = array<i64: 1, 256>}, {transform_indices = @transform_4, window_bounds = array<i64: 128, 256>}]} {
    %c0 = arith.constant 0 : index
    %c0_0 = arith.constant 0 : index
    %0 = vector.load %arg3[%c0, %c0_0] : memref<128x16xf32, #tpu.memory_space<vmem>>, vector<128x16xf32>
    %c0_1 = arith.constant 0 : index
    %c0_2 = arith.constant 0 : index
    %1 = vector.load %arg4[%c0_1, %c0_2] : memref<16x256xf32, #tpu.memory_space<vmem>>, vector<16x256xf32>
    %cst = arith.constant dense<0.000000e+00> : vector<128x256xf32>
    %2 = tpu.matmul %0, %1, %cst {dimension_numbers = #tpu.dot_dimension_numbers<[1], [0], [0], [1], [0, 0, 1, 1], [], []>} : vector<128x16xf32>, vector<16x256xf32>, vector<128x256xf32> -> vector<128x256xf32>
    %c0_3 = arith.constant 0 : index
    %c0_4 = arith.constant 0 : index
    %3 = vector.load %arg5[%c0_3, %c0_4] : memref<128x1xf32, #tpu.memory_space<vmem>>, vector<128x1xf32>
    %c0_5 = arith.constant 0 : index
    %c0_6 = arith.constant 0 : index
    %4 = vector.load %arg6[%c0_5, %c0_6] : memref<1x256xf32, #tpu.memory_space<vmem>>, vector<1x256xf32>
    %5 = vector.broadcast %3 : vector<128x1xf32> to vector<128x256xf32>
    %6 = vector.broadcast %4 : vector<1x256xf32> to vector<128x256xf32>
    %7 = arith.addf %5, %6 : vector<128x256xf32>
    %cst_7 = arith.constant 2.000000e+00 : f32
    %8 = vector.broadcast %cst_7 : f32 to vector<128x256xf32>
    %9 = arith.mulf %8, %2 : vector<128x256xf32>
    %10 = arith.subf %7, %9 : vector<128x256xf32>
    %cst_8 = arith.constant 0.000000e+00 : f32
    %11 = vector.broadcast %cst_8 : f32 to vector<128x256xf32>
    %12 = arith.maximumf %10, %11 : vector<128x256xf32>
    %c0_9 = arith.constant 0 : index
    %13 = memref.load %arg2[%c0_9] : memref<1xf32, #tpu.memory_space<smem>>
    %14 = vector.broadcast %13 : f32 to vector<128x256xf32>
    %15 = arith.mulf %12, %14 : vector<128x256xf32>
    %16 = math.exp %15 : vector<128x256xf32>
    %c0_10 = arith.constant 0 : index
    %c0_11 = arith.constant 0 : index
    %17 = vector.load %arg7[%c0_10, %c0_11] : memref<128x256xf32, #tpu.memory_space<vmem>>, vector<128x256xf32>
    tpu.vector_store %arg7[%c0_10, %c0_11], %16 {strides = array<i32>} : memref<128x256xf32, #tpu.memory_space<vmem>>, vector<128x256xf32>,
    return
  }
  func.func @transform_0(%arg0: i32, %arg1: i32, %arg2: memref<1xf32, #tpu.memory_space<smem>>) -> (i32, i32) {
    %c0_i32 = arith.constant 0 : i32
    %c0_i32_0 = arith.constant 0 : i32
    return %arg0, %c0_i32 : i32, i32
  }
  func.func @transform_1(%arg0: i32, %arg1: i32, %arg2: memref<1xf32, #tpu.memory_space<smem>>) -> (i32, i32) {
    %c0_i32 = arith.constant 0 : i32
    %c0_i32_0 = arith.constant 0 : i32
    return %c0_i32, %arg1 : i32, i32
  }
  func.func @transform_2(%arg0: i32, %arg1: i32, %arg2: memref<1xf32, #tpu.memory_space<smem>>) -> (i32, i32) {
    %c0_i32 = arith.constant 0 : i32
    %c0_i32_0 = arith.constant 0 : i32
    return %arg0, %c0_i32 : i32, i32
  }
  func.func @transform_3(%arg0: i32, %arg1: i32, %arg2: memref<1xf32, #tpu.memory_space<smem>>) -> (i32, i32) {
    %c0_i32 = arith.constant 0 : i32
    %c0_i32_0 = arith.constant 0 : i32
    return %c0_i32, %arg1 : i32, i32
  }
  func.func @transform_4(%arg0: i32, %arg1: i32, %arg2: memref<1xf32, #tpu.memory_space<smem>>) -> (i32, i32) {
    %c0_i32 = arith.constant 0 : i32
    return %arg0, %arg1 : i32, i32
  }
}

</mosaic_0001>

<bundles_post_ra>
// kernel: tpu_custom_call.1
= control target key start
LH: loop header
LB: loop body
LE: loop exit
PB: predicated region body
PF: predicated region fallthrough
CT: control target
= control target key end

     0   :  { %v730_v3 = vmov 0   ;;  %vm40_vm0 = vcmask 130048   ;;  %s1003_s0 = inlined_call_operand.<no memory space> [shape: f32[1], index: 0, kind: input, shape index: {}]   ;;  %s1004_s1 = inlined_call_operand.vmem [shape: f32[128,16], index: 1, kind: input, shape index: {}]   ;;  %s1005_s2 = inlined_call_operand.vmem [shape: f32[16,256], index: 2, kind: input, shape index: {}]   ;;  %s1006_s3 = inlined_call_operand.vmem [shape: f32[128,1], index: 3, kind: input, shape index: {}]   ;;  %s1007_s4 = inlined_call_operand.vmem [shape: f32[1,256], index: 4, kind: input, shape index: {}]   ;;  %s1008_s5 = inlined_call_operand.hbm [shape: f32[128,256], index: 5, kind: output, shape index: {}]  }
   0x1   :  { %v38_v0 = vld [vmem:[%s1005_s2 + $0x10] sm:$0xff]  ;;  %v39_v1 = vld [vmem:[%s1005_s2 + $0x18] sm:$0xff]  ;;  %v219_v2 = vld [vmem:[%s1006_s3] sm:$0xff]  ;;  %637 = vset.pattern.permute.xlu0 %v730_v3  ;;  %638 = vset.pattern.permute.xlu1 %v730_v3 }
   0x2   :  { %103 = vmatpush.msra.mxu0 %v38_v0  ;;  %v36_v4 = vld [vmem:[%s1005_s2] sm:$0xff]  ;;  %629 = vmatpush.msra.mxu2 %v38_v0  ;;  %v37_v5 = vld [vmem:[%s1005_s2 + $0x8] sm:$0xff]  ;;  %v221_v8 = vld [vmem:[%s1006_s3 + $0x10] sm:$0xff] }
   0x3   :  { %168 = vmatpush.msra.mxu1 %v39_v1  ;;  %631 = vmatpush.msra.mxu3 %v39_v1  ;;  %v20_v6 = vld [vmem:[%s1004_s1] sm:$0xff]  ;;  %v220_v10 = vld [vmem:[%s1006_s3 + $0x8] sm:$0xff] }
   0x4   :  { %238 = vperm.xlu0 %637, %v219_v2   ;;  %v28_v7 = vld [vmem:[%s1004_s1 + $0x40] sm:$0xff]  ;;  %104 = vmatpush.msra.mxu0 %v36_v4 }
   0x5   :  { %630 = vmatpush.msra.mxu2 %v36_v4  ;;  %169 = vmatpush.msra.mxu1 %v37_v5  ;;  %v223_v9 = vld [vmem:[%s1006_s3 + $0x20] sm:$0xff] }
   0x6   :  { %632 = vmatpush.msra.mxu3 %v37_v5  ;;  %597 = vmatmul.msk.f32.vlgmr.msra.gmra.mxu0 %vm40_vm0, %v20_v6 }
   0x7   :  { %605 = vmatmul.msk.f32.vlgmr.msra.gmra.mxu2 %vm40_vm0, %v28_v7  ;;  %613 = vmatmul.msk.f32.vlgmr.msra.gmra.mxu1 %vm40_vm0, %v20_v6 }
   0x8   :  { %621 = vmatmul.msk.f32.vlgmr.msra.gmra.mxu3 %vm40_vm0, %v28_v7  ;;  %639 = vset.pattern.permute.xlu2 %v730_v3 }
   0x9   :  { %11 = vsyncpa [#allocation5], 0  ;;  %248 = vperm.xlu1 %638, %v221_v8   ;;  %258 = vperm.xlu2 %639, %v223_v9   ;;  %v21_v11 = vld [vmem:[%s1004_s1 + $0x8] sm:$0xff]  ;;  %v222_v13 = vld [vmem:[%s1006_s3 + $0x18] sm:$0xff]  ;;  %v924_v55 = vstv %s1003_s0  ;;  %s731_s0 = smov [#allocation4]   ;;  %s585_s16 = sshll.u32 %s1008_s5, 4  ;;  %s586_s16 = int_to_ptr.hbm [resolvable:$true] %s585_s16 }
   0xa   :  { %v29_v12 = vld [vmem:[%s1004_s1 + $0x48] sm:$0xff]  ;;  %v225_v15 = vld [vmem:[%s1006_s3 + $0x30] sm:$0xff]  ;;  %v226_v18 = vld [vmem:[%s1006_s3 + $0x38] sm:$0xff]  ;;  %s583_s13 = sshll.u32 %s731_s0, 4  ;;  %s732_s17 = smov 256   ;;  %s584_s13 = int_to_ptr.vmem [resolvable:$true] %s583_s13 }
   0xb   :  { %v224_v14 = vld [vmem:[%s1006_s3 + $0x28] sm:$0xff]  ;;  %v22_v16 = vld [vmem:[%s1004_s1 + $0x10] sm:$0xff]  ;;  %v227_v19 = vld [vmem:[%s1006_s3 + $0x40] sm:$0xff]  ;;  %s733_s18 = smov 16  }
   0xc   :  { %243 = vperm.xlu0 %637, %v220_v10   ;;  %v30_v17 = vld [vmem:[%s1004_s1 + $0x50] sm:$0xff]  ;;  %v228_v20 = vld [vmem:[%s1006_s3 + $0x48] sm:$0xff]  ;;  %v23_v21 = vld [vmem:[%s1004_s1 + $0x18] sm:$0xff] }
   0xd   :  { %v31_v22 = vld [vmem:[%s1004_s1 + $0x58] sm:$0xff]  ;;  %v229_v23 = vld [vmem:[%s1006_s3 + $0x50] sm:$0xff]  ;;  %v231_v25 = vld [vmem:[%s1006_s3 + $0x60] sm:$0xff] }
   0xe   :  { %598 = vmatmul.msk.f32.gmra.mxu0 %vm40_vm0, %v21_v11  ;;  %v230_v24 = vld [vmem:[%s1006_s3 + $0x58] sm:$0xff]  ;;  %v24_v26 = vld [vmem:[%s1004_s1 + $0x20] sm:$0xff]  ;;  %v232_v28 = vld [vmem:[%s1006_s3 + $0x68] sm:$0xff] }
   0xf   :  { %606 = vmatmul.msk.f32.gmra.mxu2 %vm40_vm0, %v29_v12  ;;  %614 = vmatmul.msk.f32.gmra.mxu1 %vm40_vm0, %v21_v11  ;;  %v32_v27 = vld [vmem:[%s1004_s1 + $0x60] sm:$0xff]  ;;  %v233_v29 = vld [vmem:[%s1006_s3 + $0x70] sm:$0xff]  ;;  %v234_v30 = vld [vmem:[%s1006_s3 + $0x78] sm:$0xff] }
  0x10   :  { %622 = vmatmul.msk.f32.gmra.mxu3 %vm40_vm0, %v29_v12  ;;  %v25_v31 = vld [vmem:[%s1004_s1 + $0x28] sm:$0xff]  ;;  %v26_v33 = vld [vmem:[%s1004_s1 + $0x30] sm:$0xff]  ;;  %v27_v35 = vld [vmem:[%s1004_s1 + $0x38] sm:$0xff] }
  0x11   :  { %253 = vperm.xlu1 %638, %v222_v13   ;;  %263 = vperm.xlu2 %639, %v224_v14   ;;  %v33_v32 = vld [vmem:[%s1004_s1 + $0x68] sm:$0xff]  ;;  %v34_v34 = vld [vmem:[%s1004_s1 + $0x70] sm:$0xff]  ;;  %v35_v36 = vld [vmem:[%s1004_s1 + $0x78] sm:$0xff] }
  0x12   :  { %v235_v39 = vld [vmem:[%s1007_s4] sm:$0x3] }
  0x13   :  { %v911_v43 = vperm.slane %v235_v39, 0  ;;  %v913_v44 = vperm.slane %v235_v39, 1 }
  0x14   :  { %268 = vperm.xlu0 %637, %v225_v15  }
  0x16   :  { %599 = vmatmul.msk.f32.gmra.mxu0 %vm40_vm0, %v22_v16 }
  0x17   :  { %607 = vmatmul.msk.f32.gmra.mxu2 %vm40_vm0, %v30_v17  ;;  %615 = vmatmul.msk.f32.gmra.mxu1 %vm40_vm0, %v22_v16 }
  0x18   :  { %623 = vmatmul.msk.f32.gmra.mxu3 %vm40_vm0, %v30_v17 }
  0x19   :  { %273 = vperm.xlu1 %638, %v226_v18   ;;  %278 = vperm.xlu2 %639, %v227_v19  }
  0x1c   :  { %283 = vperm.xlu0 %637, %v228_v20  }
  0x1e   :  { %600 = vmatmul.msk.f32.gmra.mxu0 %vm40_vm0, %v23_v21 }
  0x1f   :  { %608 = vmatmul.msk.f32.gmra.mxu2 %vm40_vm0, %v31_v22  ;;  %616 = vmatmul.msk.f32.gmra.mxu1 %vm40_vm0, %v23_v21 }
  0x20   :  { %624 = vmatmul.msk.f32.gmra.mxu3 %vm40_vm0, %v31_v22 }
  0x21   :  { %288 = vperm.xlu1 %638, %v229_v23   ;;  %293 = vperm.xlu2 %639, %v230_v24  }
  0x24   :  { %298 = vperm.xlu0 %637, %v231_v25  }
  0x26   :  { %601 = vmatmul.msk.f32.gmra.mxu0 %vm40_vm0, %v24_v26 }
  0x27   :  { %609 = vmatmul.msk.f32.gmra.mxu2 %vm40_vm0, %v32_v27  ;;  %617 = vmatmul.msk.f32.gmra.mxu1 %vm40_vm0, %v24_v26 }
  0x28   :  { %625 = vmatmul.msk.f32.gmra.mxu3 %vm40_vm0, %v32_v27 }
  0x29   :  { %303 = vperm.xlu1 %638, %v232_v28   ;;  %308 = vperm.xlu2 %639, %v233_v29  }
  0x2c   :  { %313 = vperm.xlu0 %637, %v234_v30  }
  0x2e   :  { %602 = vmatmul.msk.f32.gmra.mxu0 %vm40_vm0, %v25_v31 }
  0x2f   :  { %610 = vmatmul.msk.f32.gmra.mxu2 %vm40_vm0, %v33_v32  ;;  %618 = vmatmul.msk.f32.gmra.mxu1 %vm40_vm0, %v25_v31 }
  0x30   :  { %626 = vmatmul.msk.f32.gmra.mxu3 %vm40_vm0, %v33_v32 }
  0x36   :  { %603 = vmatmul.msk.f32.gmra.mxu0 %vm40_vm0, %v26_v33 }
  0x37   :  { %611 = vmatmul.msk.f32.gmra.mxu2 %vm40_vm0, %v34_v34  ;;  %619 = vmatmul.msk.f32.gmra.mxu1 %vm40_vm0, %v26_v33 }
  0x38   :  { %627 = vmatmul.msk.f32.gmra.mxu3 %vm40_vm0, %v34_v34 }
  0x3e   :  { %604 = vmatmul.msk.f32.gmra.mxu0 %vm40_vm0, %v27_v35 }
  0x3f   :  { %612 = vmatmul.msk.f32.gmra.mxu2 %vm40_vm0, %v35_v36  ;;  %620 = vmatmul.msk.f32.gmra.mxu1 %vm40_vm0, %v27_v35 }
  0x40   :  { %628 = vmatmul.msk.f32.gmra.mxu3 %vm40_vm0, %v35_v36 }
  0x63   :  { %v904_v37 = vpop.permute.xlu2 %258 }
  0x6b   :  { %v909_v40 = vpop.permute.xlu2 %263 }
  0x73   :  { %v279_v53 = vpop.permute.xlu2 %278 }
  0x74   :  { %v337_v58 = vadd.f32 %v911_v43, %v279_v53  ;;  %v338_v60 = vadd.f32 %v913_v44, %v279_v53 }
  0x76   :  { %v239_v38 = vpop.permute.xlu0 %238 }
  0x77   :  { %v321_v45 = vadd.f32 %v911_v43, %v239_v38  ;;  %v322_v46 = vadd.f32 %v913_v44, %v239_v38 }
  0x7b   :  { %v249_v41 = vpop.permute.xlu1 %248 }
  0x7c   :  { %v325_v26 = vadd.f32 %v911_v43, %v249_v41  ;;  %v326_v31 = vadd.f32 %v913_v44, %v249_v41 }
  0x7e   :  { %v244_v42 = vpop.permute.xlu0 %243 }
  0x7f   :  { %v323_v62 = vadd.f32 %v911_v43, %v244_v42  ;;  %v324_v2 = vadd.f32 %v913_v44, %v244_v42 }
  0x83   :  { %v106_v47 = vpop.f32.mrf.mxu0  ;;  %v917_v48 = vpop.permute.xlu1 %253 }
  0x84   :  { %v353_v49 = vmul.f32 2.0, %v106_v47  ;;  %v171_v50 = vpop.f32.mrf.mxu1 }
  0x85   :  { %v354_v51 = vmul.f32 2.0, %v171_v50 }
  0x86   :  { %v919_v52 = vpop.permute.xlu0 %268  ;;  %v385_v54 = vsub.f32 %v321_v45, %v353_v49 }
  0x87   :  { %v386_v56 = vsub.f32 %v322_v46, %v354_v51 }
  0x88   :  { %v417_v57 = vmax.f32 %v385_v54, 0.0 }
  0x89   :  { %v418_v59 = vmax.f32 %v386_v56, 0.0 }
  0x8a   :  { %v130_v61 = vpop.f32.mrf.mxu2  ;;  %v451_v63 = vmul.f32 %v924_v55, %v417_v57 }
  0x8b   :  { %v369_v0 = vmul.f32 2.0, %v130_v61  ;;  %v195_v1 = vpop.f32.mrf.mxu3  ;;  %v452_v3 = vmul.f32 %v924_v55, %v418_v59  ;;  %v109_v5 = vpop.f32.mrf.mxu0 }
  0x8c   :  { %v370_v4 = vmul.f32 2.0, %v195_v1  ;;  %v932_v6 = vpop.permute.xlu1 %273  ;;  %v483_v7 = vmul.f32 1.442695, %v451_v63  ;;  %v355_v9 = vmul.f32 2.0, %v109_v5  ;;  %v174_v10 = vpop.f32.mrf.mxu1  ;;  %v327_v1 = vadd.f32 %v911_v43, %v917_v48 }
  0x8d   :  { %v401_v8 = vsub.f32 %v337_v58, %v369_v0  ;;  %v485_v11 = vmul.f32 1.442695, %v452_v3  ;;  %v356_v13 = vmul.f32 2.0, %v174_v10 }
  0x8e   :  { %v402_v12 = vsub.f32 %v338_v60, %v370_v4  ;;  %640 = vpow2.f32 %v483_v7  ;;  %v387_v15 = vsub.f32 %v323_v62, %v355_v9  ;;  %v284_v18 = vpop.permute.xlu0 %283 }
  0x8f   :  { %v433_v14 = vmax.f32 %v401_v8, 0.0  ;;  %642 = vpow2.f32 %v485_v11  ;;  %v388_v17 = vsub.f32 %v324_v2, %v356_v13  ;;  %v339_v21 = vadd.f32 %v911_v43, %v284_v18 }
  0x90   :  { %v434_v16 = vmax.f32 %v402_v12, 0.0  ;;  %v419_v20 = vmax.f32 %v387_v15, 0.0  ;;  %v340_v24 = vadd.f32 %v913_v44, %v284_v18  ;;  %v328_v8 = vadd.f32 %v913_v44, %v917_v48 }
  0x91   :  { %v467_v19 = vmul.f32 %v924_v55, %v433_v14  ;;  %v420_v23 = vmax.f32 %v388_v17, 0.0 }
  0x92   :  { %v468_v22 = vmul.f32 %v924_v55, %v434_v16  ;;  %v133_v25 = vpop.f32.mrf.mxu2  ;;  %v453_v28 = vmul.f32 %v924_v55, %v419_v20 }
  0x93   :  { %v515_v27 = vmul.f32 1.442695, %v467_v19  ;;  %v371_v29 = vmul.f32 2.0, %v133_v25  ;;  %v198_v30 = vpop.f32.mrf.mxu3  ;;  %v454_v33 = vmul.f32 %v924_v55, %v420_v23  ;;  %v112_v35 = vpop.f32.mrf.mxu0 }
  0x94   :  { %v517_v32 = vmul.f32 1.442695, %v468_v22  ;;  %v372_v34 = vmul.f32 2.0, %v198_v30  ;;  %v641_v36 = vpop.eup %640  ;;  %v487_v38 = vmul.f32 1.442695, %v453_v28  ;;  %v357_v42 = vmul.f32 2.0, %v112_v35  ;;  %v177_v45 = vpop.f32.mrf.mxu1 }
  0x95   :  { %644 = vpow2.f32 %v515_v27  ;;  %v403_v39 = vsub.f32 %v339_v21, %v371_v29  ;;  %v643_v46 = vpop.eup %642  ;;  %547 = vst [vmem:[#allocation4] sm:$0xff] %v641_v36  ;;  %v489_v47 = vmul.f32 1.442695, %v454_v33  ;;  %v358_v50 = vmul.f32 2.0, %v177_v45  ;;  %v289_v51 = vpop.permute.xlu1 %288 }
  0x96   :  { %646 = vpow2.f32 %v517_v32  ;;  %v404_v49 = vsub.f32 %v340_v24, %v372_v34  ;;  %548 = vst [vmem:[#allocation4 + $0x8] sm:$0xff] %v643_v46  ;;  %v389_v53 = vsub.f32 %v325_v26, %v357_v42  ;;  %v341_v59 = vadd.f32 %v911_v43, %v289_v51  ;;  %v294_v23 = vpop.permute.xlu2 %293 }
  0x97   :  { %648 = vpow2.f32 %v487_v38  ;;  %v435_v41 = vmax.f32 %v403_v39, 0.0  ;;  %v390_v56 = vsub.f32 %v326_v31, %v358_v50  ;;  %v342_v62 = vadd.f32 %v913_v44, %v289_v51 }
  0x98   :  { %650 = vpow2.f32 %v489_v47  ;;  %v436_v54 = vmax.f32 %v404_v49, 0.0  ;;  %v421_v58 = vmax.f32 %v389_v53, 0.0  ;;  %v343_v26 = vadd.f32 %v911_v43, %v294_v23 }
  0x99   :  { %v469_v57 = vmul.f32 %v924_v55, %v435_v41  ;;  %v422_v61 = vmax.f32 %v390_v56, 0.0  ;;  %v344_v29 = vadd.f32 %v913_v44, %v294_v23  ;;  %v329_v34 = vadd.f32 %v911_v43, %v904_v37 }
  0x9a   :  { %v470_v60 = vmul.f32 %v924_v55, %v436_v54  ;;  %v136_v63 = vpop.f32.mrf.mxu2  ;;  %v455_v3 = vmul.f32 %v924_v55, %v421_v58  ;;  %v330_v45 = vadd.f32 %v913_v44, %v904_v37 }
  0x9b   :  { %v645_v0 = vpop.eup %644  ;;  %v519_v2 = vmul.f32 1.442695, %v469_v57  ;;  %v373_v4 = vmul.f32 2.0, %v136_v63  ;;  %v201_v5 = vpop.f32.mrf.mxu3  ;;  %v456_v10 = vmul.f32 %v924_v55, %v422_v61 }
  0x9c   :  { %v647_v7 = vpop.eup %646  ;;  %563 = vst [vmem:[#allocation4 + $0x80] sm:$0xff] %v645_v0  ;;  %v521_v9 = vmul.f32 1.442695, %v470_v60  ;;  %v374_v11 = vmul.f32 2.0, %v201_v5  ;;  %v115_v12 = vpop.f32.mrf.mxu0  ;;  %v491_v14 = vmul.f32 1.442695, %v455_v3  ;;  %v332_v3 = vadd.f32 %v913_v44, %v909_v40 }
  0x9d   :  { %v649_v13 = vpop.eup %648  ;;  %564 = vst [vmem:[#allocation4 + $0x88] sm:$0xff] %v647_v7  ;;  %652 = vpow2.f32 %v519_v2  ;;  %v405_v15 = vsub.f32 %v341_v59, %v373_v4  ;;  %v359_v16 = vmul.f32 2.0, %v115_v12  ;;  %v180_v17 = vpop.f32.mrf.mxu1  ;;  %v493_v19 = vmul.f32 1.442695, %v456_v10 }
  0x9e   :  { %v651_v18 = vpop.eup %650  ;;  %549 = vst [vmem:[#allocation4 + $0x10] sm:$0xff] %v649_v13  ;;  %654 = vpow2.f32 %v521_v9  ;;  %v406_v20 = vsub.f32 %v342_v62, %v374_v11  ;;  %v360_v21 = vmul.f32 2.0, %v180_v17  ;;  %v331_v2 = vadd.f32 %v911_v43, %v909_v40  ;;  %v299_v4 = vpop.permute.xlu0 %298 }
  0x9f   :  { %550 = vst [vmem:[#allocation4 + $0x18] sm:$0xff] %v651_v18  ;;  %656 = vpow2.f32 %v491_v14  ;;  %v437_v48 = vmax.f32 %v405_v15, 0.0  ;;  %v391_v22 = vsub.f32 %v327_v1, %v359_v16  ;;  %v345_v10 = vadd.f32 %v911_v43, %v299_v4 }
  0xa0   :  { %658 = vpow2.f32 %v493_v19  ;;  %v438_v24 = vmax.f32 %v406_v20, 0.0  ;;  %v392_v25 = vsub.f32 %v328_v8, %v360_v21  ;;  %v346_v16 = vadd.f32 %v913_v44, %v299_v4 }
  0xa1   :  { %v471_v27 = vmul.f32 %v924_v55, %v437_v48  ;;  %v423_v28 = vmax.f32 %v391_v22, 0.0 }
  0xa2   :  { %v472_v30 = vmul.f32 %v924_v55, %v438_v24  ;;  %v424_v31 = vmax.f32 %v392_v25, 0.0  ;;  %v139_v32 = vpop.f32.mrf.mxu2 }
  0xa3   :  { %v653_v33 = vpop.eup %652  ;;  %v523_v35 = vmul.f32 1.442695, %v471_v27  ;;  %v457_v36 = vmul.f32 %v924_v55, %v423_v28  ;;  %v375_v38 = vmul.f32 2.0, %v139_v32  ;;  %v204_v39 = vpop.f32.mrf.mxu3 }
  0xa4   :  { %v655_v42 = vpop.eup %654  ;;  %565 = vst [vmem:[#allocation4 + $0x90] sm:$0xff] %v653_v33  ;;  %v525_v46 = vmul.f32 1.442695, %v472_v30  ;;  %v458_v47 = vmul.f32 %v924_v55, %v424_v31  ;;  %v376_v49 = vmul.f32 2.0, %v204_v39  ;;  %v118_v50 = vpop.f32.mrf.mxu0 }
  0xa5   :  { %v657_v51 = vpop.eup %656  ;;  %566 = vst [vmem:[#allocation4 + $0x98] sm:$0xff] %v655_v42  ;;  %660 = vpow2.f32 %v523_v35  ;;  %v495_v41 = vmul.f32 1.442695, %v457_v36  ;;  %v407_v53 = vsub.f32 %v343_v26, %v375_v38  ;;  %v361_v54 = vmul.f32 2.0, %v118_v50  ;;  %v183_v56 = vpop.f32.mrf.mxu1 }
  0xa6   :  { %v659_v57 = vpop.eup %658  ;;  %551 = vst [vmem:[#allocation4 + $0x20] sm:$0xff] %v657_v51  ;;  %662 = vpow2.f32 %v525_v46  ;;  %v497_v58 = vmul.f32 1.442695, %v458_v47  ;;  %v408_v59 = vsub.f32 %v344_v29, %v376_v49  ;;  %v362_v60 = vmul.f32 2.0, %v183_v56  ;;  %v304_v30 = vpop.permute.xlu1 %303 }
  0xa7   :  { %552 = vst [vmem:[#allocation4 + $0x28] sm:$0xff] %v659_v57  ;;  %664 = vpow2.f32 %v495_v41  ;;  %v439_v37 = vmax.f32 %v407_v53, 0.0  ;;  %v393_v61 = vsub.f32 %v329_v34, %v361_v54  ;;  %v333_v35 = vadd.f32 %v911_v43, %v919_v52 }
  0xa8   :  { %666 = vpow2.f32 %v497_v58  ;;  %v440_v62 = vmax.f32 %v408_v59, 0.0  ;;  %v394_v63 = vsub.f32 %v330_v45, %v362_v60  ;;  %v334_v36 = vadd.f32 %v913_v44, %v919_v52 }
  0xa9   :  { %v473_v0 = vmul.f32 %v924_v55, %v439_v37  ;;  %v425_v1 = vmax.f32 %v393_v61, 0.0  ;;  %v347_v46 = vadd.f32 %v911_v43, %v304_v30  ;;  %v348_v53 = vadd.f32 %v913_v44, %v304_v30 }
  0xaa   :  { %v474_v5 = vmul.f32 %v924_v55, %v440_v62  ;;  %v426_v7 = vmax.f32 %v394_v63, 0.0  ;;  %v142_v8 = vpop.f32.mrf.mxu2 }
  0xab   :  { %v661_v9 = vpop.eup %660  ;;  %v527_v11 = vmul.f32 1.442695, %v473_v0  ;;  %v459_v12 = vmul.f32 %v924_v55, %v425_v1  ;;  %v377_v13 = vmul.f32 2.0, %v142_v8  ;;  %v207_v14 = vpop.f32.mrf.mxu3 }
  0xac   :  { %v663_v15 = vpop.eup %662  ;;  %567 = vst [vmem:[#allocation4 + $0xa0] sm:$0xff] %v661_v9  ;;  %v529_v17 = vmul.f32 1.442695, %v474_v5  ;;  %v460_v40 = vmul.f32 %v924_v55, %v426_v7  ;;  %v378_v18 = vmul.f32 2.0, %v207_v14  ;;  %v121_v19 = vpop.f32.mrf.mxu0 }
  0xad   :  { %v665_v20 = vpop.eup %664  ;;  %568 = vst [vmem:[#allocation4 + $0xa8] sm:$0xff] %v663_v15  ;;  %668 = vpow2.f32 %v527_v11  ;;  %v499_v21 = vmul.f32 1.442695, %v459_v12  ;;  %v409_v48 = vsub.f32 %v345_v10, %v377_v13  ;;  %v363_v22 = vmul.f32 2.0, %v121_v19  ;;  %v186_v23 = vpop.f32.mrf.mxu1 }
  0xae   :  { %v667_v24 = vpop.eup %666  ;;  %553 = vst [vmem:[#allocation4 + $0x30] sm:$0xff] %v665_v20  ;;  %670 = vpow2.f32 %v529_v17  ;;  %v501_v25 = vmul.f32 1.442695, %v460_v40  ;;  %v410_v26 = vsub.f32 %v346_v16, %v378_v18  ;;  %v364_v27 = vmul.f32 2.0, %v186_v23 }
  0xaf   :  { %554 = vst [vmem:[#allocation4 + $0x38] sm:$0xff] %v667_v24  ;;  %672 = vpow2.f32 %v499_v21  ;;  %v441_v28 = vmax.f32 %v409_v48, 0.0  ;;  %v395_v29 = vsub.f32 %v331_v2, %v363_v22  ;;  %v309_v2 = vpop.permute.xlu2 %308  ;;  %v335_v16 = vadd.f32 %v911_v43, %v932_v6 }
  0xb0   :  { %674 = vpow2.f32 %v501_v25  ;;  %v442_v31 = vmax.f32 %v410_v26, 0.0  ;;  %v396_v32 = vsub.f32 %v332_v3, %v364_v27  ;;  %v349_v10 = vadd.f32 %v911_v43, %v309_v2 }
  0xb1   :  { %v475_v33 = vmul.f32 %v924_v55, %v441_v28  ;;  %v427_v34 = vmax.f32 %v395_v29, 0.0  ;;  %v350_v11 = vadd.f32 %v913_v44, %v309_v2  ;;  %v336_v21 = vadd.f32 %v913_v44, %v932_v6 }
  0xb2   :  { %v476_v38 = vmul.f32 %v924_v55, %v442_v31  ;;  %v428_v39 = vmax.f32 %v396_v32, 0.0  ;;  %v145_v42 = vpop.f32.mrf.mxu2 }
  0xb3   :  { %v669_v45 = vpop.eup %668  ;;  %v531_v47 = vmul.f32 1.442695, %v475_v33  ;;  %v461_v49 = vmul.f32 %v924_v55, %v427_v34  ;;  %v379_v50 = vmul.f32 2.0, %v145_v42  ;;  %v210_v51 = vpop.f32.mrf.mxu3 }
  0xb4   :  { %v671_v41 = vpop.eup %670  ;;  %569 = vst [vmem:[#allocation4 + $0xb0] sm:$0xff] %v669_v45  ;;  %v533_v54 = vmul.f32 1.442695, %v476_v38  ;;  %v462_v56 = vmul.f32 %v924_v55, %v428_v39  ;;  %v380_v52 = vmul.f32 2.0, %v210_v51  ;;  %v124_v57 = vpop.f32.mrf.mxu0 }
  0xb5   :  { %v673_v58 = vpop.eup %672  ;;  %570 = vst [vmem:[#allocation4 + $0xb8] sm:$0xff] %v671_v41  ;;  %676 = vpow2.f32 %v531_v47  ;;  %v503_v59 = vmul.f32 1.442695, %v461_v49  ;;  %v411_v60 = vsub.f32 %v347_v46, %v379_v50  ;;  %v365_v37 = vmul.f32 2.0, %v124_v57  ;;  %v189_v61 = vpop.f32.mrf.mxu1 }
  0xb6   :  { %v675_v62 = vpop.eup %674  ;;  %555 = vst [vmem:[#allocation4 + $0x40] sm:$0xff] %v673_v58  ;;  %678 = vpow2.f32 %v533_v54  ;;  %v505_v63 = vmul.f32 1.442695, %v462_v56  ;;  %v412_v0 = vsub.f32 %v348_v53, %v380_v52  ;;  %v366_v1 = vmul.f32 2.0, %v189_v61 }
  0xb7   :  { %556 = vst [vmem:[#allocation4 + $0x48] sm:$0xff] %v675_v62  ;;  %680 = vpow2.f32 %v503_v59  ;;  %v443_v3 = vmax.f32 %v411_v60, 0.0  ;;  %v397_v4 = vsub.f32 %v333_v35, %v365_v37  ;;  %v314_v35 = vpop.permute.xlu0 %313 }
  0xb8   :  { %682 = vpow2.f32 %v505_v63  ;;  %v444_v5 = vmax.f32 %v412_v0, 0.0  ;;  %v398_v7 = vsub.f32 %v334_v36, %v366_v1  ;;  %v351_v50 = vadd.f32 %v911_v43, %v314_v35 }
  0xb9   :  { %v477_v8 = vmul.f32 %v924_v55, %v443_v3  ;;  %v429_v9 = vmax.f32 %v397_v4, 0.0  ;;  %v352_v52 = vadd.f32 %v913_v44, %v314_v35 }
  0xba   :  { %v478_v12 = vmul.f32 %v924_v55, %v444_v5  ;;  %v430_v13 = vmax.f32 %v398_v7, 0.0  ;;  %v148_v14 = vpop.f32.mrf.mxu2 }
  0xbb   :  { %v677_v15 = vpop.eup %676  ;;  %v535_v17 = vmul.f32 1.442695, %v477_v8  ;;  %v463_v40 = vmul.f32 %v924_v55, %v429_v9  ;;  %v381_v18 = vmul.f32 2.0, %v148_v14  ;;  %v213_v19 = vpop.f32.mrf.mxu3 }
  0xbc   :  { %v679_v20 = vpop.eup %678  ;;  %571 = vst [vmem:[#allocation4 + $0xc0] sm:$0xff] %v677_v15  ;;  %v537_v48 = vmul.f32 1.442695, %v478_v12  ;;  %v464_v22 = vmul.f32 %v924_v55, %v430_v13  ;;  %v382_v23 = vmul.f32 2.0, %v213_v19  ;;  %v127_v24 = vpop.f32.mrf.mxu0 }
  0xbd   :  { %v681_v25 = vpop.eup %680  ;;  %572 = vst [vmem:[#allocation4 + $0xc8] sm:$0xff] %v679_v20  ;;  %684 = vpow2.f32 %v535_v17  ;;  %v507_v26 = vmul.f32 1.442695, %v463_v40  ;;  %v413_v27 = vsub.f32 %v349_v10, %v381_v18  ;;  %v367_v28 = vmul.f32 2.0, %v127_v24  ;;  %v192_v29 = vpop.f32.mrf.mxu1 }
  0xbe   :  { %v683_v30 = vpop.eup %682  ;;  %557 = vst [vmem:[#allocation4 + $0x50] sm:$0xff] %v681_v25  ;;  %686 = vpow2.f32 %v537_v48  ;;  %v509_v31 = vmul.f32 1.442695, %v464_v22  ;;  %v414_v32 = vsub.f32 %v350_v11, %v382_v23  ;;  %v368_v33 = vmul.f32 2.0, %v192_v29 }
  0xbf   :  { %558 = vst [vmem:[#allocation4 + $0x58] sm:$0xff] %v683_v30  ;;  %688 = vpow2.f32 %v507_v26  ;;  %v445_v6 = vmax.f32 %v413_v27, 0.0  ;;  %v399_v34 = vsub.f32 %v335_v16, %v367_v28 }
  0xc0   :  { %690 = vpow2.f32 %v509_v31  ;;  %v446_v36 = vmax.f32 %v414_v32, 0.0  ;;  %v400_v38 = vsub.f32 %v336_v21, %v368_v33 }
  0xc1   :  { %v479_v39 = vmul.f32 %v924_v55, %v445_v6  ;;  %v431_v42 = vmax.f32 %v399_v34, 0.0 }
  0xc2   :  { %v480_v45 = vmul.f32 %v924_v55, %v446_v36  ;;  %v432_v46 = vmax.f32 %v400_v38, 0.0  ;;  %v151_v47 = vpop.f32.mrf.mxu2 }
  0xc3   :  { %v685_v49 = vpop.eup %684  ;;  %v539_v51 = vmul.f32 1.442695, %v479_v39  ;;  %v465_v41 = vmul.f32 %v924_v55, %v431_v42  ;;  %v383_v53 = vmul.f32 2.0, %v151_v47  ;;  %v216_v54 = vpop.f32.mrf.mxu3 }
  0xc4   :  { %v687_v56 = vpop.eup %686  ;;  %573 = vst [vmem:[#allocation4 + $0xd0] sm:$0xff] %v685_v49  ;;  %v541_v57 = vmul.f32 1.442695, %v480_v45  ;;  %v466_v58 = vmul.f32 %v924_v55, %v432_v46  ;;  %v384_v59 = vmul.f32 2.0, %v216_v54 }
  0xc5   :  { %v689_v60 = vpop.eup %688  ;;  %574 = vst [vmem:[#allocation4 + $0xd8] sm:$0xff] %v687_v56  ;;  %692 = vpow2.f32 %v539_v51  ;;  %v511_v37 = vmul.f32 1.442695, %v465_v41  ;;  %v415_v61 = vsub.f32 %v351_v50, %v383_v53 }
  0xc6   :  { %v691_v62 = vpop.eup %690  ;;  %559 = vst [vmem:[#allocation4 + $0x60] sm:$0xff] %v689_v60  ;;  %694 = vpow2.f32 %v541_v57  ;;  %v513_v43 = vmul.f32 1.442695, %v466_v58  ;;  %v416_v63 = vsub.f32 %v352_v52, %v384_v59 }
  0xc7   :  { %560 = vst [vmem:[#allocation4 + $0x68] sm:$0xff] %v691_v62  ;;  %696 = vpow2.f32 %v511_v37  ;;  %v447_v0 = vmax.f32 %v415_v61, 0.0 }
  0xc8   :  { %698 = vpow2.f32 %v513_v43  ;;  %v448_v44 = vmax.f32 %v416_v63, 0.0 }
  0xc9   :  { %v481_v1 = vmul.f32 %v924_v55, %v447_v0 }
  0xca   :  { %v482_v2 = vmul.f32 %v924_v55, %v448_v44 }
  0xcb   :  { %v693_v3 = vpop.eup %692  ;;  %v543_v4 = vmul.f32 1.442695, %v481_v1 }
  0xcc   :  { %v695_v5 = vpop.eup %694  ;;  %575 = vst [vmem:[#allocation4 + $0xe0] sm:$0xff] %v693_v3  ;;  %v545_v7 = vmul.f32 1.442695, %v482_v2 }
  0xcd   :  { %v697_v8 = vpop.eup %696  ;;  %576 = vst [vmem:[#allocation4 + $0xe8] sm:$0xff] %v695_v5  ;;  %700 = vpow2.f32 %v543_v4 }
  0xce   :  { %v699_v9 = vpop.eup %698  ;;  %561 = vst [vmem:[#allocation4 + $0x70] sm:$0xff] %v697_v8  ;;  %702 = vpow2.f32 %v545_v7 }
  0xcf   :  { %562 = vst [vmem:[#allocation4 + $0x78] sm:$0xff] %v699_v9 }
  0xd3   :  { %v701_v55 = vpop.eup %700 }
  0xd4   :  { %v703_v10 = vpop.eup %702  ;;  %577 = vst [vmem:[#allocation4 + $0xf0] sm:$0xff] %v701_v55 }
  0xd5   :  { %578 = vst [vmem:[#allocation4 + $0xf8] sm:$0xff] %v703_v10 }
  0xd6   :  { %591 = dma.vmem_to_hbm [thread:$0]  %s584_s13, 4096, %s586_s16, [#allocation5], %s732_s17, %s732_s17, %s733_s18  }
  0xd7   :  { %728 = dma.done.wait [#allocation5], 4096  }
  0xd8   :  { %729 = vsyncadd [#allocation5], 4294963200 }
  0xd9   :  { %596 = vsyncpa [#allocation5], 1 }

</bundles_post_ra>
